<compile_context>
chip_gen: v7x
topology: tpu7x:2x2x1
jax: 0.10.0
libtpu: 0.0.40
codegen_flags: <defaults>
</compile_context>

<pallas_src>
import functools

import jax
import jax.numpy as jnp
from jax import lax
from jax.experimental import pallas as pl
from jax.experimental.pallas import tpu as pltpu


def _round_up(x, m):
    return (x + m - 1) // m * m


def _is_pow2(x):
    return x > 0 and (x & (x - 1)) == 0


def _choose_imgs_per_tile(n, w, max_lanes=512):
    """Largest divisor t of n with t*w <= max_lanes: images packed per tile."""
    best = 1
    for t in range(1, n + 1):
        if n % t == 0 and t * w <= max_lanes:
            best = t
    return best


def _pool_contour_kernel(x_ref, o_ref, *, num_classes, img_shift, from_labels):
    # x_ref: (1, C, H, Wt) float logits  OR  (1, H, Wt) int32 labels.
    # o_ref: (1, OC, H, Wt) float32.
    OC, H, Wt = o_ref.shape[1], o_ref.shape[2], o_ref.shape[3]
    K = num_classes - 1
    f32 = jnp.float32

    # ---- class masks for channels 1..C-1 (binary {0,1} in f32) -------------
    if from_labels:
        lab = x_ref[0]                                    # (H, Wt) int32
        masks = [(lab == c).astype(f32) for c in range(1, num_classes)]
    else:
        # Fused argmax -> one-hot: carry per-channel "is argmax" booleans.
        # Strict '>' reproduces torch.argmax first-index tie-breaking.
        x = x_ref[0]                                      # (C, H, Wt)
        best = x[0]
        is_best = [None] * num_classes
        for c in range(1, num_classes):
            xc = x[c]
            gt = xc > best
            best = jnp.where(gt, xc, best)
            not_gt = jnp.logical_not(gt)
            for p in range(1, c):
                is_best[p] = jnp.logical_and(is_best[p], not_gt)
            is_best[c] = gt
        masks = [is_best[c].astype(f32) for c in range(1, num_classes)]
    # NOTE: masks are non-negative {0,1}; zero fill at boundaries is therefore
    # equivalent to MaxPool2d's -inf padding.  Keep it that way.

    # ---- boundary-validity masks from rolled iotas --------------------------
    # pltpu.roll is a circular XLU rotate.  Rolling the coordinate iotas with
    # the SAME op as the data tells us exactly where each value came from, so
    # the masks are sign-convention-free and handle lane padding and packed
    # images uniformly.  Built once per tile, shared by all K channels.
    col = lax.broadcasted_iota(jnp.int32, (H, Wt), 1)
    row = lax.broadcasted_iota(jnp.int32, (H, Wt), 0)
    h_amts = (1, 2, H - 1, H - 2)            # circular form of +-1, +-2
    w_amts = (1, 2, Wt - 1, Wt - 2)

    h_valid = {}
    for a in h_amts:
        src = pltpu.roll(row, shift=a, axis=0)
        h_valid[a] = jnp.abs(src - row) <= 2              # drop the wrap seam
    w_valid = {}
    for a in w_amts:
        src = pltpu.roll(col, shift=a, axis=1)
        ok = jnp.abs(src - col) <= 2                      # drop the wrap seam
        if img_shift is not None:                         # packed images: stay
            ok = jnp.logical_and(                         # inside one image
                ok, (src >> img_shift) == (col >> img_shift))
        w_valid[a] = ok

    # ---- separable 5x5 dilation: roll (XLU) + max (VPU) ---------------------
    zero = jnp.zeros((H, Wt), f32)

    def dilate(m):
        ph = m
        for a in h_amts:
            ph = jnp.maximum(
                ph, jnp.where(h_valid[a], pltpu.roll(m, shift=a, axis=0), zero))
        pw = ph
        for a in w_amts:
            pw = jnp.maximum(
                pw, jnp.where(w_valid[a], pltpu.roll(ph, shift=a, axis=1), zero))
        return pw

    pooled = [dilate(m) for m in masks]

    # ---- pairwise products + zero channels, ONE slab store ------------------
    planes = []
    for j in range(K):
        for k in range(j + 1, K):
            planes.append(pooled[j] * pooled[k])
    planes += [zero] * (OC - len(planes))
    o_ref[0] = jnp.stack(planes, axis=0)


def pool_contour_head(x, input_channel=4, output_channel=7):
    """Forward pass of PoolContourHead.

    x: (N, C, H, W) float logits (f32/bf16, consumed as-is), or
       (N, H, W) integer label map (one-hot built in-kernel).
    Returns (N, output_channel, H, W) float32.
    """
    C, OC = input_channel, output_channel
    from_labels = x.ndim < 4
    if from_labels:
        N, H, W = x.shape
        x = x.astype(jnp.int32)
        in_item = 4
    else:
        N, Cx, H, W = x.shape
        assert Cx == C, "input channel mismatch"
        in_item = x.dtype.itemsize            # no pre-cast: bf16 halves HBM reads
    n_pairs = (C - 1) * (C - 2) // 2
    assert n_pairs <= OC, "output_channel too small for (C-1 choose 2)"

    # ---- tiling / layout decisions ------------------------------------------
    LANE, SUB = 128, 8
    H8 = _round_up(H, SUB)
    if W % LANE == 0:
        # Lane-aligned images: NCHW blocks read/written directly, one image per
        # grid step, zero wrapper-side HBM layout passes.
        t, Wt = 1, W
    else:
        # Small / unaligned W: pack t images along the lane axis (only when W
        # is a power of two so the in-kernel same-image test is a shift), then
        # zero-pad lanes to a multiple of 128 for dense stores / native rolls.
        t = _choose_imgs_per_tile(N, W) if _is_pow2(W) else 1
        Wt = _round_up(t * W, LANE)
    G = N // t
    img_shift = (W.bit_length() - 1) if t > 1 else None

    # ---- layout plumbing (no-op when W % 128 == 0 and H % 8 == 0) ------------
    xs = x
    if from_labels:
        if t > 1:
            xs = xs.reshape(G, t, H, W).transpose(0, 2, 1, 3).reshape(G, H, t * W)
        pad_h, pad_w = H8 - H, Wt - xs.shape[-1]
        if pad_h or pad_w:
            xs = jnp.pad(xs, ((0, 0), (0, pad_h), (0, pad_w)))
        in_spec = pl.BlockSpec((1, H8, Wt), lambda g: (g, 0, 0))
        in_block = H8 * Wt * in_item
    else:
        if t > 1:
            xs = xs.reshape(G, t, C, H, W).transpose(0, 2, 3, 1, 4)
            xs = xs.reshape(G, C, H, t * W)
        pad_h, pad_w = H8 - H, Wt - xs.shape[-1]
        if pad_h or pad_w:
            xs = jnp.pad(xs, ((0, 0), (0, 0), (0, pad_h), (0, pad_w)))
        in_spec = pl.BlockSpec((1, C, H8, Wt), lambda g: (g, 0, 0, 0))
        in_block = C * H8 * Wt * in_item

    out_block = OC * H8 * Wt * 4
    # Per-step working set: 2x(in+out) double buffers + live f32/i32 temps
    # (K masks + K pooled + iotas/valid masks + the stacked store value).
    temps = (2 * (C - 1) + OC + 8) * H8 * Wt * 4
    vmem_limit = int(min(96 << 20,
                         max(32 << 20, 2 * (in_block + out_block) + temps)))

    cost = pl.CostEstimate(
        flops=int(64 * G * H8 * Wt),          # ~64 VPU ops / pixel, no MXU use
        transcendentals=0,
        bytes_accessed=int(G * (in_block + out_block)))

    kernel = functools.partial(
        _pool_contour_kernel, num_classes=C,
        img_shift=img_shift, from_labels=from_labels)

    out = pl.pallas_call(
        kernel,
        out_shape=jax.ShapeDtypeStruct((G, OC, H8, Wt), jnp.float32),
        grid=(G,),
        in_specs=[in_spec],
        out_specs=pl.BlockSpec((1, OC, H8, Wt), lambda g: (g, 0, 0, 0)),
        compiler_params=pltpu.CompilerParams(
            # image tiles are independent -> megacore sharding on v7x
            dimension_semantics=("parallel",),
            vmem_limit_bytes=vmem_limit),
        cost_estimate=cost,
    )(xs)

    # ---- undo padding / lane fold (no-op on the aligned path) ----------------
    if H8 != H or Wt != t * W:
        out = out[:, :, :H, : t * W]
    if t > 1:
        out = out.reshape(G, OC, H, t, W).transpose(0, 3, 1, 2, 4)
        out = out.reshape(N, OC, H, W)
    return out


def _reference(x, input_channel=4, output_channel=7):
    """Pure-JAX reference mirroring the PyTorch forward (onehot_convert=True)."""
    if x.ndim < 4:
        oh = jax.nn.one_hot(x, input_channel, axis=1, dtype=jnp.float32)
    else:
        oh = jax.nn.one_hot(jnp.argmax(x, axis=1), input_channel, axis=1,
                            dtype=jnp.float32)

    def maxpool5(ch):  # (N, H, W), 5x5, stride 1, pad 2 (-inf padding)
        return lax.reduce_window(ch, -jnp.inf, lax.max,
                                 window_dimensions=(1, 5, 5),
                                 window_strides=(1, 1, 1),
                                 padding=((0, 0), (2, 2), (2, 2)))

    pools = [maxpool5(oh[:, i]) for i in range(1, input_channel)]
    N, H, W = oh.shape[0], oh.shape[2], oh.shape[3]
    out = jnp.zeros((N, output_channel, H, W), jnp.float32)
    idx = 0
    for j in range(1, input_channel):
        for k in range(j + 1, input_channel):
            out = out.at[:, idx].set(pools[j - 1] * pools[k - 1])
            idx += 1
    return out


if __name__ == "__main__":
    key = jax.random.PRNGKey(0)

    # Logits path (the module's onehot_convert=True branch).
    x = jax.random.normal(key, (2, 4, 16, 16), dtype=jnp.float32)
    out = jax.block_until_ready(pool_contour_head(x))
    ref = _reference(x)
    assert out.shape == (2, 7, 16, 16)
    assert jnp.allclose(out, ref, atol=1e-6), "logits path mismatch vs reference"

    # Integer label-map path (len(x.size()) < 4 branch), masks built in-kernel.
    labels = jax.random.randint(jax.random.PRNGKey(1), (2, 16, 16), 0, 4)
    out_l = jax.block_until_ready(pool_contour_head(labels))
    ref_l = _reference(labels)
    assert out_l.shape == (2, 7, 16, 16)
    assert jnp.allclose(out_l, ref_l, atol=1e-6), "label path mismatch vs reference"

    print("KERNEL_OK")
</pallas_src>

<mosaic_0001>
module attributes {stable_mosaic.version = 11 : i64} {
  func.func @_pool_contour_kernel(%arg0: i32, %arg1: memref<1x4x16x128xf32, #tpu.memory_space<vmem>>, %arg2: memref<1x7x16x128xf32, #tpu.memory_space<vmem>>) attributes {dimension_semantics = [#tpu.dimension_semantics<parallel>], iteration_bounds = array<i64: 1>, scalar_prefetch = 0 : i64, scratch_operands = 0 : i64, tpu.core_type = #tpu.core_type<tc>, window_params = [{transform_indices = @transform_0, window_bounds = array<i64: 1, 4, 16, 128>}, {transform_indices = @transform_1, window_bounds = array<i64: 1, 7, 16, 128>}]} {
    %c0 = arith.constant 0 : index
    %c0_0 = arith.constant 0 : index
    %c0_1 = arith.constant 0 : index
    %c0_2 = arith.constant 0 : index
    %0 = vector.load %arg1[%c0, %c0_0, %c0_1, %c0_2] : memref<1x4x16x128xf32, #tpu.memory_space<vmem>>, vector<1x4x16x128xf32>
    %1 = vector.shape_cast %0 : vector<1x4x16x128xf32> to vector<4x16x128xf32>
    %2 = vector.extract_strided_slice %1 {offsets = [0, 0, 0], sizes = [1, 16, 128], strides = [1, 1, 1]} : vector<4x16x128xf32> to vector<1x16x128xf32>
    %3 = vector.shape_cast %2 : vector<1x16x128xf32> to vector<16x128xf32>
    %4 = vector.extract_strided_slice %1 {offsets = [1, 0, 0], sizes = [1, 16, 128], strides = [1, 1, 1]} : vector<4x16x128xf32> to vector<1x16x128xf32>
    %5 = vector.shape_cast %4 : vector<1x16x128xf32> to vector<16x128xf32>
    %6 = arith.cmpf ogt, %5, %3 : vector<16x128xf32>
    %7 = arith.select %6, %5, %3 : vector<16x128xi1>, vector<16x128xf32>
    %8 = vector.extract_strided_slice %1 {offsets = [2, 0, 0], sizes = [1, 16, 128], strides = [1, 1, 1]} : vector<4x16x128xf32> to vector<1x16x128xf32>
    %9 = vector.shape_cast %8 : vector<1x16x128xf32> to vector<16x128xf32>
    %10 = arith.cmpf ogt, %9, %7 : vector<16x128xf32>
    %11 = arith.select %10, %9, %7 : vector<16x128xi1>, vector<16x128xf32>
    %cst = arith.constant dense<true> : vector<16x128xi1>
    %12 = arith.xori %10, %cst : vector<16x128xi1>
    %13 = arith.andi %6, %12 : vector<16x128xi1>
    %14 = vector.extract_strided_slice %1 {offsets = [3, 0, 0], sizes = [1, 16, 128], strides = [1, 1, 1]} : vector<4x16x128xf32> to vector<1x16x128xf32>
    %15 = vector.shape_cast %14 : vector<1x16x128xf32> to vector<16x128xf32>
    %16 = arith.cmpf ogt, %15, %11 : vector<16x128xf32>
    %cst_3 = arith.constant dense<true> : vector<16x128xi1>
    %17 = arith.xori %16, %cst_3 : vector<16x128xi1>
    %18 = arith.andi %13, %17 : vector<16x128xi1>
    %19 = arith.andi %10, %17 : vector<16x128xi1>
    %20 = arith.extui %18 : vector<16x128xi1> to vector<16x128xi32>
    %21 = arith.sitofp %20 : vector<16x128xi32> to vector<16x128xf32>
    %22 = arith.extui %19 : vector<16x128xi1> to vector<16x128xi32>
    %23 = arith.sitofp %22 : vector<16x128xi32> to vector<16x128xf32>
    %24 = arith.extui %16 : vector<16x128xi1> to vector<16x128xi32>
    %25 = arith.sitofp %24 : vector<16x128xi32> to vector<16x128xf32>
    %26 = tpu.iota {dimensions = array<i32: 1>} : vector<16x128xi32>
    %27 = tpu.iota {dimensions = array<i32: 0>} : vector<16x128xi32>
    %c1_i32 = arith.constant 1 : i32
    %28 = tpu.dynamic_rotate %27 by %c1_i32 dim 0 : vector<16x128xi32>, i32 -> vector<16x128xi32>
    %29 = arith.subi %28, %27 : vector<16x128xi32>
    %30 = math.absi %29 : vector<16x128xi32>
    %c2_i32 = arith.constant 2 : i32
    %31 = vector.broadcast %c2_i32 : i32 to vector<16x128xi32>
    %32 = arith.cmpi sle, %30, %31 : vector<16x128xi32>
    %c2_i32_4 = arith.constant 2 : i32
    %33 = tpu.dynamic_rotate %27 by %c2_i32_4 dim 0 : vector<16x128xi32>, i32 -> vector<16x128xi32>
    %34 = arith.subi %33, %27 : vector<16x128xi32>
    %35 = math.absi %34 : vector<16x128xi32>
    %c2_i32_5 = arith.constant 2 : i32
    %36 = vector.broadcast %c2_i32_5 : i32 to vector<16x128xi32>
    %37 = arith.cmpi sle, %35, %36 : vector<16x128xi32>
    %c15_i32 = arith.constant 15 : i32
    %38 = tpu.dynamic_rotate %27 by %c15_i32 dim 0 : vector<16x128xi32>, i32 -> vector<16x128xi32>
    %39 = arith.subi %38, %27 : vector<16x128xi32>
    %40 = math.absi %39 : vector<16x128xi32>
    %c2_i32_6 = arith.constant 2 : i32
    %41 = vector.broadcast %c2_i32_6 : i32 to vector<16x128xi32>
    %42 = arith.cmpi sle, %40, %41 : vector<16x128xi32>
    %c14_i32 = arith.constant 14 : i32
    %43 = tpu.dynamic_rotate %27 by %c14_i32 dim 0 : vector<16x128xi32>, i32 -> vector<16x128xi32>
    %44 = arith.subi %43, %27 : vector<16x128xi32>
    %45 = math.absi %44 : vector<16x128xi32>
    %c2_i32_7 = arith.constant 2 : i32
    %46 = vector.broadcast %c2_i32_7 : i32 to vector<16x128xi32>
    %47 = arith.cmpi sle, %45, %46 : vector<16x128xi32>
    %c1_i32_8 = arith.constant 1 : i32
    %48 = tpu.dynamic_rotate %26 by %c1_i32_8 dim 1 : vector<16x128xi32>, i32 -> vector<16x128xi32>
    %49 = arith.subi %48, %26 : vector<16x128xi32>
    %50 = math.absi %49 : vector<16x128xi32>
    %c2_i32_9 = arith.constant 2 : i32
    %51 = vector.broadcast %c2_i32_9 : i32 to vector<16x128xi32>
    %52 = arith.cmpi sle, %50, %51 : vector<16x128xi32>
    %c4_i32 = arith.constant 4 : i32
    %53 = vector.broadcast %c4_i32 : i32 to vector<16x128xi32>
    %54 = arith.shrsi %48, %53 : vector<16x128xi32>
    %c4_i32_10 = arith.constant 4 : i32
    %55 = vector.broadcast %c4_i32_10 : i32 to vector<16x128xi32>
    %56 = arith.shrsi %26, %55 : vector<16x128xi32>
    %57 = arith.cmpi eq, %54, %56 : vector<16x128xi32>
    %58 = arith.andi %52, %57 : vector<16x128xi1>
    %c2_i32_11 = arith.constant 2 : i32
    %59 = tpu.dynamic_rotate %26 by %c2_i32_11 dim 1 : vector<16x128xi32>, i32 -> vector<16x128xi32>
    %60 = arith.subi %59, %26 : vector<16x128xi32>
    %61 = math.absi %60 : vector<16x128xi32>
    %c2_i32_12 = arith.constant 2 : i32
    %62 = vector.broadcast %c2_i32_12 : i32 to vector<16x128xi32>
    %63 = arith.cmpi sle, %61, %62 : vector<16x128xi32>
    %c4_i32_13 = arith.constant 4 : i32
    %64 = vector.broadcast %c4_i32_13 : i32 to vector<16x128xi32>
    %65 = arith.shrsi %59, %64 : vector<16x128xi32>
    %c4_i32_14 = arith.constant 4 : i32
    %66 = vector.broadcast %c4_i32_14 : i32 to vector<16x128xi32>
    %67 = arith.shrsi %26, %66 : vector<16x128xi32>
    %68 = arith.cmpi eq, %65, %67 : vector<16x128xi32>
    %69 = arith.andi %63, %68 : vector<16x128xi1>
    %c127_i32 = arith.constant 127 : i32
    %70 = tpu.dynamic_rotate %26 by %c127_i32 dim 1 : vector<16x128xi32>, i32 -> vector<16x128xi32>
    %71 = arith.subi %70, %26 : vector<16x128xi32>
    %72 = math.absi %71 : vector<16x128xi32>
    %c2_i32_15 = arith.constant 2 : i32
    %73 = vector.broadcast %c2_i32_15 : i32 to vector<16x128xi32>
    %74 = arith.cmpi sle, %72, %73 : vector<16x128xi32>
    %c4_i32_16 = arith.constant 4 : i32
    %75 = vector.broadcast %c4_i32_16 : i32 to vector<16x128xi32>
    %76 = arith.shrsi %70, %75 : vector<16x128xi32>
    %c4_i32_17 = arith.constant 4 : i32
    %77 = vector.broadcast %c4_i32_17 : i32 to vector<16x128xi32>
    %78 = arith.shrsi %26, %77 : vector<16x128xi32>
    %79 = arith.cmpi eq, %76, %78 : vector<16x128xi32>
    %80 = arith.andi %74, %79 : vector<16x128xi1>
    %c126_i32 = arith.constant 126 : i32
    %81 = tpu.dynamic_rotate %26 by %c126_i32 dim 1 : vector<16x128xi32>, i32 -> vector<16x128xi32>
    %82 = arith.subi %81, %26 : vector<16x128xi32>
    %83 = math.absi %82 : vector<16x128xi32>
    %c2_i32_18 = arith.constant 2 : i32
    %84 = vector.broadcast %c2_i32_18 : i32 to vector<16x128xi32>
    %85 = arith.cmpi sle, %83, %84 : vector<16x128xi32>
    %c4_i32_19 = arith.constant 4 : i32
    %86 = vector.broadcast %c4_i32_19 : i32 to vector<16x128xi32>
    %87 = arith.shrsi %81, %86 : vector<16x128xi32>
    %c4_i32_20 = arith.constant 4 : i32
    %88 = vector.broadcast %c4_i32_20 : i32 to vector<16x128xi32>
    %89 = arith.shrsi %26, %88 : vector<16x128xi32>
    %90 = arith.cmpi eq, %87, %89 : vector<16x128xi32>
    %91 = arith.andi %85, %90 : vector<16x128xi1>
    %cst_21 = arith.constant 0.000000e+00 : f32
    %92 = vector.broadcast %cst_21 : f32 to vector<16x128xf32>
    %c1_i32_22 = arith.constant 1 : i32
    %93 = tpu.dynamic_rotate %21 by %c1_i32_22 dim 0 : vector<16x128xf32>, i32 -> vector<16x128xf32>
    %94 = arith.select %32, %93, %92 : vector<16x128xi1>, vector<16x128xf32>
    %95 = arith.maximumf %21, %94 : vector<16x128xf32>
    %c2_i32_23 = arith.constant 2 : i32
    %96 = tpu.dynamic_rotate %21 by %c2_i32_23 dim 0 : vector<16x128xf32>, i32 -> vector<16x128xf32>
    %97 = arith.select %37, %96, %92 : vector<16x128xi1>, vector<16x128xf32>
    %98 = arith.maximumf %95, %97 : vector<16x128xf32>
    %c15_i32_24 = arith.constant 15 : i32
    %99 = tpu.dynamic_rotate %21 by %c15_i32_24 dim 0 : vector<16x128xf32>, i32 -> vector<16x128xf32>
    %100 = arith.select %42, %99, %92 : vector<16x128xi1>, vector<16x128xf32>
    %101 = arith.maximumf %98, %100 : vector<16x128xf32>
    %c14_i32_25 = arith.constant 14 : i32
    %102 = tpu.dynamic_rotate %21 by %c14_i32_25 dim 0 : vector<16x128xf32>, i32 -> vector<16x128xf32>
    %103 = arith.select %47, %102, %92 : vector<16x128xi1>, vector<16x128xf32>
    %104 = arith.maximumf %101, %103 : vector<16x128xf32>
    %c1_i32_26 = arith.constant 1 : i32
    %105 = tpu.dynamic_rotate %104 by %c1_i32_26 dim 1 : vector<16x128xf32>, i32 -> vector<16x128xf32>
    %106 = arith.select %58, %105, %92 : vector<16x128xi1>, vector<16x128xf32>
    %107 = arith.maximumf %104, %106 : vector<16x128xf32>
    %c2_i32_27 = arith.constant 2 : i32
    %108 = tpu.dynamic_rotate %104 by %c2_i32_27 dim 1 : vector<16x128xf32>, i32 -> vector<16x128xf32>
    %109 = arith.select %69, %108, %92 : vector<16x128xi1>, vector<16x128xf32>
    %110 = arith.maximumf %107, %109 : vector<16x128xf32>
    %c127_i32_28 = arith.constant 127 : i32
    %111 = tpu.dynamic_rotate %104 by %c127_i32_28 dim 1 : vector<16x128xf32>, i32 -> vector<16x128xf32>
    %112 = arith.select %80, %111, %92 : vector<16x128xi1>, vector<16x128xf32>
    %113 = arith.maximumf %110, %112 : vector<16x128xf32>
    %c126_i32_29 = arith.constant 126 : i32
    %114 = tpu.dynamic_rotate %104 by %c126_i32_29 dim 1 : vector<16x128xf32>, i32 -> vector<16x128xf32>
    %115 = arith.select %91, %114, %92 : vector<16x128xi1>, vector<16x128xf32>
    %116 = arith.maximumf %113, %115 : vector<16x128xf32>
    %c1_i32_30 = arith.constant 1 : i32
    %117 = tpu.dynamic_rotate %23 by %c1_i32_30 dim 0 : vector<16x128xf32>, i32 -> vector<16x128xf32>
    %118 = arith.select %32, %117, %92 : vector<16x128xi1>, vector<16x128xf32>
    %119 = arith.maximumf %23, %118 : vector<16x128xf32>
    %c2_i32_31 = arith.constant 2 : i32
    %120 = tpu.dynamic_rotate %23 by %c2_i32_31 dim 0 : vector<16x128xf32>, i32 -> vector<16x128xf32>
    %121 = arith.select %37, %120, %92 : vector<16x128xi1>, vector<16x128xf32>
    %122 = arith.maximumf %119, %121 : vector<16x128xf32>
    %c15_i32_32 = arith.constant 15 : i32
    %123 = tpu.dynamic_rotate %23 by %c15_i32_32 dim 0 : vector<16x128xf32>, i32 -> vector<16x128xf32>
    %124 = arith.select %42, %123, %92 : vector<16x128xi1>, vector<16x128xf32>
    %125 = arith.maximumf %122, %124 : vector<16x128xf32>
    %c14_i32_33 = arith.constant 14 : i32
    %126 = tpu.dynamic_rotate %23 by %c14_i32_33 dim 0 : vector<16x128xf32>, i32 -> vector<16x128xf32>
    %127 = arith.select %47, %126, %92 : vector<16x128xi1>, vector<16x128xf32>
    %128 = arith.maximumf %125, %127 : vector<16x128xf32>
    %c1_i32_34 = arith.constant 1 : i32
    %129 = tpu.dynamic_rotate %128 by %c1_i32_34 dim 1 : vector<16x128xf32>, i32 -> vector<16x128xf32>
    %130 = arith.select %58, %129, %92 : vector<16x128xi1>, vector<16x128xf32>
    %131 = arith.maximumf %128, %130 : vector<16x128xf32>
    %c2_i32_35 = arith.constant 2 : i32
    %132 = tpu.dynamic_rotate %128 by %c2_i32_35 dim 1 : vector<16x128xf32>, i32 -> vector<16x128xf32>
    %133 = arith.select %69, %132, %92 : vector<16x128xi1>, vector<16x128xf32>
    %134 = arith.maximumf %131, %133 : vector<16x128xf32>
    %c127_i32_36 = arith.constant 127 : i32
    %135 = tpu.dynamic_rotate %128 by %c127_i32_36 dim 1 : vector<16x128xf32>, i32 -> vector<16x128xf32>
    %136 = arith.select %80, %135, %92 : vector<16x128xi1>, vector<16x128xf32>
    %137 = arith.maximumf %134, %136 : vector<16x128xf32>
    %c126_i32_37 = arith.constant 126 : i32
    %138 = tpu.dynamic_rotate %128 by %c126_i32_37 dim 1 : vector<16x128xf32>, i32 -> vector<16x128xf32>
    %139 = arith.select %91, %138, %92 : vector<16x128xi1>, vector<16x128xf32>
    %140 = arith.maximumf %137, %139 : vector<16x128xf32>
    %c1_i32_38 = arith.constant 1 : i32
    %141 = tpu.dynamic_rotate %25 by %c1_i32_38 dim 0 : vector<16x128xf32>, i32 -> vector<16x128xf32>
    %142 = arith.select %32, %141, %92 : vector<16x128xi1>, vector<16x128xf32>
    %143 = arith.maximumf %25, %142 : vector<16x128xf32>
    %c2_i32_39 = arith.constant 2 : i32
    %144 = tpu.dynamic_rotate %25 by %c2_i32_39 dim 0 : vector<16x128xf32>, i32 -> vector<16x128xf32>
    %145 = arith.select %37, %144, %92 : vector<16x128xi1>, vector<16x128xf32>
    %146 = arith.maximumf %143, %145 : vector<16x128xf32>
    %c15_i32_40 = arith.constant 15 : i32
    %147 = tpu.dynamic_rotate %25 by %c15_i32_40 dim 0 : vector<16x128xf32>, i32 -> vector<16x128xf32>
    %148 = arith.select %42, %147, %92 : vector<16x128xi1>, vector<16x128xf32>
    %149 = arith.maximumf %146, %148 : vector<16x128xf32>
    %c14_i32_41 = arith.constant 14 : i32
    %150 = tpu.dynamic_rotate %25 by %c14_i32_41 dim 0 : vector<16x128xf32>, i32 -> vector<16x128xf32>
    %151 = arith.select %47, %150, %92 : vector<16x128xi1>, vector<16x128xf32>
    %152 = arith.maximumf %149, %151 : vector<16x128xf32>
    %c1_i32_42 = arith.constant 1 : i32
    %153 = tpu.dynamic_rotate %152 by %c1_i32_42 dim 1 : vector<16x128xf32>, i32 -> vector<16x128xf32>
    %154 = arith.select %58, %153, %92 : vector<16x128xi1>, vector<16x128xf32>
    %155 = arith.maximumf %152, %154 : vector<16x128xf32>
    %c2_i32_43 = arith.constant 2 : i32
    %156 = tpu.dynamic_rotate %152 by %c2_i32_43 dim 1 : vector<16x128xf32>, i32 -> vector<16x128xf32>
    %157 = arith.select %69, %156, %92 : vector<16x128xi1>, vector<16x128xf32>
    %158 = arith.maximumf %155, %157 : vector<16x128xf32>
    %c127_i32_44 = arith.constant 127 : i32
    %159 = tpu.dynamic_rotate %152 by %c127_i32_44 dim 1 : vector<16x128xf32>, i32 -> vector<16x128xf32>
    %160 = arith.select %80, %159, %92 : vector<16x128xi1>, vector<16x128xf32>
    %161 = arith.maximumf %158, %160 : vector<16x128xf32>
    %c126_i32_45 = arith.constant 126 : i32
    %162 = tpu.dynamic_rotate %152 by %c126_i32_45 dim 1 : vector<16x128xf32>, i32 -> vector<16x128xf32>
    %163 = arith.select %91, %162, %92 : vector<16x128xi1>, vector<16x128xf32>
    %164 = arith.maximumf %161, %163 : vector<16x128xf32>
    %165 = arith.mulf %116, %140 : vector<16x128xf32>
    %166 = arith.mulf %116, %164 : vector<16x128xf32>
    %167 = arith.mulf %140, %164 : vector<16x128xf32>
    %168 = vector.shape_cast %165 : vector<16x128xf32> to vector<1x16x128xf32>
    %169 = vector.shape_cast %166 : vector<16x128xf32> to vector<1x16x128xf32>
    %170 = vector.shape_cast %167 : vector<16x128xf32> to vector<1x16x128xf32>
    %171 = vector.shape_cast %92 : vector<16x128xf32> to vector<1x16x128xf32>
    %172 = vector.shape_cast %92 : vector<16x128xf32> to vector<1x16x128xf32>
    %173 = vector.shape_cast %92 : vector<16x128xf32> to vector<1x16x128xf32>
    %174 = vector.shape_cast %92 : vector<16x128xf32> to vector<1x16x128xf32>
    %175 = tpu.concatenate %168, %169, %170, %171, %172, %173, %174 in 0 : vector<1x16x128xf32>, vector<1x16x128xf32>, vector<1x16x128xf32>, vector<1x16x128xf32>, vector<1x16x128xf32>, vector<1x16x128xf32>, vector<1x16x128xf32> -> vector<7x16x128xf32>
    %c0_46 = arith.constant 0 : index
    %c0_47 = arith.constant 0 : index
    %c0_48 = arith.constant 0 : index
    %c0_49 = arith.constant 0 : index
    %176 = vector.load %arg2[%c0_46, %c0_47, %c0_48, %c0_49] : memref<1x7x16x128xf32, #tpu.memory_space<vmem>>, vector<1x7x16x128xf32>
    %177 = vector.shape_cast %176 : vector<1x7x16x128xf32> to vector<7x16x128xf32>
    %178 = vector.shape_cast %175 : vector<7x16x128xf32> to vector<1x7x16x128xf32>
    tpu.vector_store %arg2[%c0_46, %c0_47, %c0_48, %c0_49], %178 {strides = array<i32>} : memref<1x7x16x128xf32, #tpu.memory_space<vmem>>, vector<1x7x16x128xf32>,
    return
  }
  func.func @transform_0(%arg0: i32) -> (i32, i32, i32, i32) {
    %c0_i32 = arith.constant 0 : i32
    %c0_i32_0 = arith.constant 0 : i32
    %c0_i32_1 = arith.constant 0 : i32
    %c0_i32_2 = arith.constant 0 : i32
    return %arg0, %c0_i32, %c0_i32_0, %c0_i32_1 : i32, i32, i32, i32
  }
  func.func @transform_1(%arg0: i32) -> (i32, i32, i32, i32) {
    %c0_i32 = arith.constant 0 : i32
    %c0_i32_0 = arith.constant 0 : i32
    %c0_i32_1 = arith.constant 0 : i32
    %c0_i32_2 = arith.constant 0 : i32
    return %arg0, %c0_i32, %c0_i32_0, %c0_i32_1 : i32, i32, i32, i32
  }
}

</mosaic_0001>

<bundles_post_ra>
// kernel: tpu_custom_call.1
= control target key start
LH: loop header
LB: loop body
LE: loop exit
PB: predicated region body
PF: predicated region fallthrough
CT: control target
= control target key end

     0   :  { %6 = vsyncpa [#allocation3], 0  ;;  %s1015_s0 = inlined_call_operand.hbm [shape: f32[1,4,16,128], index: 0, kind: input, shape index: {}]   ;;  %s1016_s1 = inlined_call_operand.hbm [shape: f32[1,7,16,128], index: 1, kind: output, shape index: {}]  }
   0x1   :  { %7 = vsyncpa [#allocation4], 0  ;;  %s534_s6 = smov [#allocation2]   ;;  %s486_s10 = scalar_lea.hbm %s1015_s0, 1024 }
   0x2   :  { %s13_s7 = sshll.u32 %s534_s6, 4  ;;  %p487_p0 = scmp.ne.s32.totalorder %s1015_s0, %s486_s10  ;;  %s14_s7 = int_to_ptr.vmem [resolvable:$true] %s13_s7 }
   0x3   :  { %p490_p1 = scmp.lt.u32.totalorder %s486_s10, %s1015_s0 }
   0x5   :  { %p492_p2 = pnand %p490_p1, %p487_p0 }
   0x7   :  { %495 = shalt.err (!%p492_p2)
}
   0x8   :  { %s496_s15 = scalar_lea.vmem %s14_s7, 1024  ;;  %p501_p4 = scmp.lt.s32.totalorder %s14_s7, %s14_s7 }
   0x9   :  { %p497_p3 = scmp.ne.s32.totalorder %s14_s7, %s496_s15  ;;  %p502_p5 = scmp.lt.s32.totalorder %s496_s15, %s496_s15 }
   0xb   :  { %p503_p6 = por %p502_p5, %p501_p4 }
   0xd   :  { %p504_p7 = pnand %p503_p6, %p497_p3 }
   0xf   :  { %507 = shalt.err (!%p504_p7)
}
  0x10   :  { %s535_s16 = smov 128   ;;  %s536_s17 = smov 8  }
  0x11   :  { %19 = dma.hbm_to_vmem [thread:$0]  %s1015_s0, 1024, %s14_s7, [#allocation3], %s535_s16, %s535_s16, %s536_s17  }
  0x12   :  { %530 = dma.done.wait [#allocation3], 1024  }
  0x13   :  { %531 = vsyncadd [#allocation3], 4294966272  ;;  %v63_v0 = vlaneseq  ;;  %v537_v1 = vmov 0.0   ;;  %s538_s0 = smov 127   ;;  %s539_s20 = smov 1   ;;  %v596_v10 = vld [vmem:[#allocation2] sm:$0xff] }
  0x14   :  { %373 = vst [vmem:[#allocation5 + $0x30] sm:$0xff] %v537_v1  ;;  %374 = vst [vmem:[#allocation5 + $0x38] sm:$0xff] %v537_v1  ;;  %v598_v11 = vld [vmem:[#allocation2 + $0x8] sm:$0xff]  ;;  %v600_v12 = vld [vmem:[#allocation2 + $0x10] sm:$0xff]  ;;  %s540_s21 = smov 126   ;;  %s541_s22 = smov 2  }
  0x15   :  { %375 = vst [vmem:[#allocation5 + $0x40] sm:$0xff] %v537_v1  ;;  %376 = vst [vmem:[#allocation5 + $0x48] sm:$0xff] %v537_v1  ;;  %v577_v2 = vand.u32 127, %v63_v0  ;;  %v579_v3 = vshrl.u32 %v63_v0, 7  ;;  %v609_v16 = vld [vmem:[#allocation2 + $0x18] sm:$0xff]  ;;  %v611_v17 = vld [vmem:[#allocation2 + $0x20] sm:$0xff]  ;;  %vm31_vm3 = vcmp.gt.f32.partialorder %v600_v12, %v596_v10 }
  0x16   :  { %377 = vst [vmem:[#allocation5 + $0x50] sm:$0xff] %v537_v1  ;;  %378 = vst [vmem:[#allocation5 + $0x58] sm:$0xff] %v537_v1  ;;  %v613_v18 = vld [vmem:[#allocation2 + $0x28] sm:$0xff]  ;;  %v29_v21 = vld [vmem:[#allocation2 + $0x30] sm:$0xff]  ;;  %vm1017_vm5 = vcmp.gt.f32.partialorder %v609_v16, %v598_v11  ;;  %v629_v22 = vsel %vm31_vm3, %v600_v12, %v596_v10  ;;  %vm542_vm14 = vmmov 1   ;;  %s543_s23 = smov [#allocation5]  }
  0x17   :  { %379 = vst [vmem:[#allocation5 + $0x60] sm:$0xff] %v537_v1  ;;  %380 = vst [vmem:[#allocation5 + $0x68] sm:$0xff] %v537_v1  ;;  %149 = vrot.lane.b32.xlu1 %v577_v2, %s538_s0  ;;  %128 = vrot.lane.b32.xlu0 %v577_v2, %s539_s20  ;;  %v586_v4 = vadd.s32 8, %v579_v3  ;;  %v68_v5 = vrot.slane %v579_v3, 7  ;;  %vm1019_vm0 = vcmp.lt.s32.totalorder %v579_v3, 1  ;;  %v83_v6 = vrot.slane %v579_v3, 6 }
  0x18   :  { %vm85_vm1 = vcmp.lt.s32.totalorder %v579_v3, 2  ;;  %v98_v9 = vrot.slane %v579_v3, 1  ;;  %vm1023_vm2 = vcmp.lt.s32.totalorder %v579_v3, 7  ;;  %v113_v14 = vrot.slane %v579_v3, 2  ;;  %v30_v25 = vld [vmem:[#allocation2 + $0x38] sm:$0xff]  ;;  %s386_s24 = sshll.u32 %s543_s23, 4  ;;  %s387_s24 = int_to_ptr.vmem [resolvable:$true] %s386_s24 }
  0x19   :  { %v69_v7 = vrot.slane %v586_v4, 7  ;;  %v84_v8 = vrot.slane %v586_v4, 6  ;;  %v99_v13 = vrot.slane %v586_v4, 1  ;;  %v114_v15 = vrot.slane %v586_v4, 2  ;;  %s508_s25 = scalar_lea.vmem %s387_s24, 1792  ;;  %p513_p9 = scmp.lt.s32.totalorder %s387_s24, %s387_s24 }
  0x1a   :  { %vm1018_vm4 = vcmp.lt.s32.totalorder %v579_v3, 6  ;;  %v638_v26 = vsel %vm1017_vm5, %v609_v16, %v598_v11  ;;  %vm35_vm6 = vcmp.gt.f32.partialorder %v611_v17, %v629_v22  ;;  %p509_p8 = scmp.ne.s32.totalorder %s387_s24, %s508_s25  ;;  %p514_p10 = scmp.lt.s32.totalorder %s508_s25, %s508_s25 }
  0x1b   :  { %159 = vrot.lane.b32.xlu1 %v577_v2, %s540_s21  ;;  %139 = vrot.lane.b32.xlu0 %v577_v2, %s541_s22  ;;  %v71_v19 = vsel %vm1019_vm0, %v68_v5, %v69_v7  ;;  %v72_v20 = vsel %vm1019_vm0, %v69_v7, %v68_v5  ;;  %v86_v27 = vsel %vm85_vm1, %v83_v6, %v84_v8 }
  0x1c   :  { %v73_v23 = vsub.s32 %v72_v20, %v579_v3  ;;  %v74_v24 = vsub.s32 %v71_v19, %v586_v4  ;;  %v87_v28 = vsel %vm85_vm1, %v84_v8, %v83_v6  ;;  %vm36_vm7 = vcmp.gt.f32.partialorder %v613_v18, %v638_v26  ;;  %p515_p11 = por %p514_p10, %p513_p9 }
  0x1d   :  { %v37_v29 = vsel %vm35_vm6, %v611_v17, %v629_v22  ;;  %v38_v32 = vsel %vm36_vm7, %v613_v18, %v638_v26  ;;  %v88_v33 = vsub.s32 %v87_v28, %v579_v3  ;;  %v89_v34 = vsub.s32 %v86_v27, %v586_v4 }
  0x1e   :  { %v76_v30 = vsub.s32 0, %v73_v23  ;;  %v79_v31 = vsub.s32 0, %v74_v24  ;;  %vm43_vm8 = vcmp.gt.f32.partialorder %v29_v21, %v37_v29  ;;  %vm44_vm9 = vcmp.gt.f32.partialorder %v30_v25, %v38_v32  ;;  %p516_p12 = pnand %p515_p11, %p509_p8 }
  0x1f   :  { %v662_v35 = vsel %vm43_vm8, 1.0, %v537_v1  ;;  %v670_v38 = vsel %vm44_vm9, 1.0, %v537_v1  ;;  %v91_v39 = vsub.s32 0, %v88_v33  ;;  %v94_v40 = vsub.s32 0, %v89_v34  ;;  %vm703_vm15 = vmxor %vm43_vm8, %vm542_vm14 }
  0x20   :  { %v664_v36 = vmin.u32 %v76_v30, %v73_v23  ;;  %v666_v37 = vmin.u32 %v79_v31, %v74_v24  ;;  %v101_v41 = vsel %vm1023_vm2, %v98_v9, %v99_v13  ;;  %v102_v42 = vsel %vm1023_vm2, %v99_v13, %v98_v9 }
  0x21   :  { %v103_v43 = vsub.s32 %v101_v41, %v579_v3  ;;  %v679_v44 = vmin.u32 %v91_v39, %v88_v33  ;;  %v681_v45 = vmin.u32 %v94_v40, %v89_v34  ;;  %v104_v46 = vsub.s32 %v102_v42, %v586_v4 }
  0x22   :  { %vm1020_vm10 = vcmp.le.s32.totalorder %v664_v36, 2  ;;  %vm82_vm11 = vcmp.le.s32.totalorder %v666_v37, 2  ;;  %v116_v47 = vsel %vm1018_vm4, %v113_v14, %v114_v15  ;;  %v117_v49 = vsel %vm1018_vm4, %v114_v15, %v113_v14  ;;  %vm718_vm4 = vmxor %vm35_vm6, %vm542_vm14 }
  0x23   :  { %v106_v48 = vsub.s32 0, %v103_v43  ;;  %v118_v50 = vsub.s32 %v116_v47, %v579_v3  ;;  %v297_v51 = vrot.slane %v662_v35, 7  ;;  %vm1022_vm12 = vcmp.le.s32.totalorder %v679_v44, 2 }
  0x24   :  { %vm1021_vm13 = vcmp.le.s32.totalorder %v681_v45, 2  ;;  %v109_v52 = vsub.s32 0, %v104_v46  ;;  %v119_v53 = vsub.s32 %v117_v49, %v586_v4  ;;  %v298_v56 = vrot.slane %v670_v38, 7 }
  0x25   :  { %v693_v54 = vmin.u32 %v106_v48, %v103_v43  ;;  %v121_v55 = vsub.s32 0, %v118_v50  ;;  %v305_v57 = vrot.slane %v662_v35, 6  ;;  %v306_v60 = vrot.slane %v670_v38, 6 }
  0x26   :  { %v697_v58 = vmin.u32 %v109_v52, %v104_v46  ;;  %v124_v59 = vsub.s32 0, %v119_v53  ;;  %v313_v61 = vrot.slane %v662_v35, 1  ;;  %v299_v0 = vsel %vm1019_vm0, %v297_v51, %v298_v56 }
  0x27   :  { %v708_v63 = vmin.u32 %v121_v55, %v118_v50  ;;  %v300_v4 = vsel %vm1019_vm0, %v298_v56, %v297_v51  ;;  %v302_v8 = vsel %vm82_vm11, %v299_v0, 0.0  ;;  %vm731_vm0 = vmxor %vm44_vm9, %vm542_vm14  ;;  %v307_v15 = vsel %vm85_vm1, %v305_v57, %v306_v60 }
  0x28   :  { %vm112_vm8 = vcmp.le.s32.totalorder %v697_v58, 2  ;;  %v723_v6 = vmin.u32 %v124_v59, %v119_v53  ;;  %v301_v7 = vsel %vm1020_vm10, %v300_v4, 0.0  ;;  %v304_v14 = vmax.f32 %v670_v38, %v302_v8  ;;  %vm49_vm10 = vmand %vm35_vm6, %vm703_vm15 }
  0x29   :  { %vm126_vm5 = vcmp.le.s32.totalorder %v708_v63, 2  ;;  %v303_v13 = vmax.f32 %v662_v35, %v301_v7  ;;  %v308_v19 = vsel %vm85_vm1, %v306_v60, %v305_v57  ;;  %v310_v20 = vsel %vm1021_vm13, %v307_v15, 0.0  ;;  %vm760_vm6 = vmand %vm31_vm3, %vm718_vm4 }
  0x2a   :  { %vm127_vm9 = vcmp.le.s32.totalorder %v723_v6, 2  ;;  %v314_v21 = vrot.slane %v670_v38, 1  ;;  %v309_v23 = vsel %vm1022_vm12, %v308_v19, 0.0  ;;  %v312_v24 = vmax.f32 %v304_v14, %v310_v20  ;;  %vm50_vm13 = vmand %vm36_vm7, %vm731_vm0 }
  0x2b   :  { %v321_v25 = vrot.slane %v662_v35, 2  ;;  %v322_v27 = vrot.slane %v670_v38, 2  ;;  %v311_v22 = vmax.f32 %v303_v13, %v309_v23  ;;  %v400_v30 = vsel %vm49_vm10, 1.0, %v537_v1  ;;  %vm47_vm10 = vmand %vm760_vm6, %vm703_vm15 }
  0x2c   :  { %v315_v28 = vsel %vm1023_vm2, %v313_v61, %v314_v21  ;;  %v316_v29 = vsel %vm1023_vm2, %v314_v21, %v313_v61  ;;  %vm1032_vm3 = vcmp.le.s32.totalorder %v693_v54, 2  ;;  %vm1033_vm4 = vcmp.lt.s32.totalorder %v579_v3, 6  ;;  %vm786_vm2 = vmxor %vm36_vm7, %vm542_vm14 }
  0x2d   :  { %v317_v10 = vsel %vm1032_vm3, %v315_v28, 0.0  ;;  %v318_v12 = vsel %vm112_vm8, %v316_v29, 0.0  ;;  %v323_v31 = vsel %vm1033_vm4, %v321_v25, %v322_v27  ;;  %vm1034_vm12 = vmmov %vm1033_vm4  ;;  %v401_v40 = vsel %vm50_vm13, 1.0, %v537_v1 }
  0x2e   :  { %v324_v32 = vsel %vm1034_vm12, %v322_v27, %v321_v25  ;;  %v319_v34 = vmax.f32 %v311_v22, %v317_v10  ;;  %v320_v35 = vmax.f32 %v312_v24, %v318_v12  ;;  %v325_v38 = vsel %vm126_vm5, %v323_v31, 0.0 }
  0x2f   :  { %v326_v39 = vsel %vm127_vm9, %v324_v32, 0.0  ;;  %v233_v18 = vrot.slane %v400_v30, 7  ;;  %v241_v26 = vrot.slane %v400_v30, 6  ;;  %v249_v41 = vrot.slane %v400_v30, 1 }
  0x30   :  { %v799_v42 = vmax.f32 %v319_v34, %v325_v38  ;;  %v801_v43 = vmax.f32 %v320_v35, %v326_v39  ;;  %v234_v46 = vrot.slane %v401_v40, 7  ;;  %v242_v47 = vrot.slane %v401_v40, 6 }
  0x31   :  { %v250_v48 = vrot.slane %v401_v40, 1  ;;  %v257_v49 = vrot.slane %v400_v30, 2  ;;  %v258_v50 = vrot.slane %v401_v40, 2  ;;  %vm1037_vm7 = vcmp.gt.f32.partialorder %v609_v16, %v598_v11 }
  0x32   :  { %vm808_vm12 = vmand %vm1037_vm7, %vm786_vm2  ;;  %v398_v52 = vsel %vm47_vm10, 1.0, %v537_v1  ;;  %v815_v53 = vpack.i.bf16 %v801_v43, %v799_v42  ;;  %vm1040_vm13 = vcmp.lt.s32.totalorder %v579_v3, 1  ;;  %v243_v11 = vsel %vm85_vm1, %v241_v26, %v242_v47 }
  0x33   :  { %v235_v55 = vsel %vm1040_vm13, %v233_v18, %v234_v46  ;;  %vm1041_vm14 = vmmov %vm1040_vm13  ;;  %v244_v16 = vsel %vm85_vm1, %v242_v47, %v241_v26  ;;  %vm1042_vm2 = vcmp.le.s32.totalorder %v664_v36, 2  ;;  %vm1043_vm15 = vcmp.le.s32.totalorder %v679_v44, 2 }
  0x34   :  { %v236_v56 = vsel %vm1041_vm14, %v234_v46, %v233_v18  ;;  %v238_v57 = vsel %vm82_vm11, %v235_v55, 0.0  ;;  %432 = vrot.lane.b32.xlu1 %v815_v53, %s541_s22  ;;  %427 = vrot.lane.b32.xlu0 %v815_v53, %s539_s20  ;;  %v245_v61 = vsel %vm1043_vm15, %v244_v16, 0.0  ;;  %vm1044_vm6 = vcmp.le.s32.totalorder %v681_v45, 2  ;;  %vm48_vm3 = vmand %vm808_vm12, %vm731_vm0 }
  0x35   :  { %v237_v59 = vsel %vm1042_vm2, %v236_v56, 0.0  ;;  %v240_v60 = vmax.f32 %v401_v40, %v238_v57  ;;  %v246_v62 = vsel %vm1044_vm6, %v243_v11, 0.0  ;;  %vm1045_vm4 = vcmp.lt.s32.totalorder %v579_v3, 7  ;;  %vm1052_vm15 = vmmov %vm1044_vm6 }
  0x36   :  { %v239_v0 = vmax.f32 %v400_v30, %v237_v59  ;;  %v251_v4 = vsel %vm1045_vm4, %v249_v41, %v250_v48  ;;  %vm1046_vm10 = vmmov %vm1045_vm4  ;;  %vm1047_vm7 = vcmp.lt.s32.totalorder %v579_v3, 6  ;;  %vm1048_vm13 = vcmp.le.s32.totalorder %v693_v54, 2 }
  0x37   :  { %v252_v5 = vsel %vm1046_vm10, %v250_v48, %v249_v41  ;;  %v259_v7 = vsel %vm1047_vm7, %v257_v49, %v258_v50  ;;  %v248_v8 = vmax.f32 %v240_v60, %v246_v62  ;;  %v253_v13 = vsel %vm1048_vm13, %v251_v4, 0.0  ;;  %vm1049_vm14 = vmmov %vm1047_vm7 }
  0x38   :  { %v254_v9 = vsel %vm112_vm8, %v252_v5, 0.0  ;;  %v260_v14 = vsel %vm1049_vm14, %v258_v50, %v257_v49  ;;  %v247_v15 = vmax.f32 %v239_v0, %v245_v61  ;;  %v261_v19 = vsel %vm126_vm5, %v259_v7, 0.0  ;;  %437 = vrot.lane.b32.xlu0 %v815_v53, %s538_s0 }
  0x39   :  { %v262_v20 = vsel %vm127_vm9, %v260_v14, 0.0  ;;  %v399_v21 = vsel %vm48_vm3, 1.0, %v537_v1  ;;  %v256_v23 = vmax.f32 %v248_v8, %v254_v9  ;;  %v169_v24 = vrot.slane %v398_v52, 7  ;;  %vm1054_vm3 = vmmov %vm1045_vm4 }
  0x3a   :  { %v170_v25 = vrot.slane %v399_v21, 7  ;;  %v177_v27 = vrot.slane %v398_v52, 6  ;;  %v255_v17 = vmax.f32 %v247_v15, %v253_v13  ;;  %v178_v22 = vrot.slane %v399_v21, 6  ;;  %vm1056_vm4 = vmmov %vm1048_vm13 }
  0x3b   :  { %v185_v28 = vrot.slane %v398_v52, 1  ;;  %v186_v29 = vrot.slane %v399_v21, 1  ;;  %v860_v30 = vmax.f32 %v256_v23, %v262_v20  ;;  %vm1050_vm0 = vcmp.lt.s32.totalorder %v579_v3, 1 }
  0x3c   :  { %v171_v10 = vsel %vm1050_vm0, %v169_v24, %v170_v25  ;;  %vm1051_vm12 = vmmov %vm1050_vm0  ;;  %v193_v1 = vrot.slane %v398_v52, 2  ;;  %v866_v31 = vmax.f32 %v255_v17, %v261_v19  ;;  %v179_v34 = vsel %vm85_vm1, %v177_v27, %v178_v22 }
  0x3d   :  { %v172_v12 = vsel %vm1051_vm12, %v170_v25, %v169_v24  ;;  %v174_v33 = vsel %vm82_vm11, %v171_v10, 0.0  ;;  %v180_v39 = vsel %vm85_vm1, %v178_v22, %v177_v27  ;;  %v182_v40 = vsel %vm1052_vm15, %v179_v34, 0.0  ;;  %vm1055_vm11 = vmmov %vm1054_vm3 }
  0x3e   :  { %v173_v32 = vsel %vm1042_vm2, %v172_v12, 0.0  ;;  %v176_v38 = vmax.f32 %v399_v21, %v174_v33  ;;  %v446_v18 = vpack.i.bf16 %v860_v30, %v866_v31  ;;  %vm1053_vm6 = vcmp.le.s32.totalorder %v679_v44, 2  ;;  %vm1057_vm1 = vmmov %vm1047_vm7 }
  0x3f   :  { %v175_v35 = vmax.f32 %v398_v52, %v173_v32  ;;  %v181_v36 = vsel %vm1053_vm6, %v180_v39, 0.0  ;;  %v187_v37 = vsel %vm1054_vm3, %v185_v28, %v186_v29  ;;  %v188_v26 = vsel %vm1055_vm11, %v186_v29, %v185_v28  ;;  %vm1058_vm10 = vmmov %vm1057_vm1 }
  0x40   :  { %v184_v46 = vmax.f32 %v176_v38, %v182_v40  ;;  %v189_v47 = vsel %vm1056_vm4, %v187_v37, 0.0  ;;  %v190_v45 = vsel %vm112_vm8, %v188_v26, 0.0  ;;  %447 = vrot.lane.b32.xlu1 %v446_v18, %s539_s20  ;;  %v194_v48 = vrot.slane %v399_v21, 2 }
  0x41   :  { %v183_v41 = vmax.f32 %v175_v35, %v181_v36  ;;  %v136_v60 = vshra.s32 %v577_v2, 4 }
  0x42   :  { %v192_v44 = vmax.f32 %v184_v46, %v190_v45  ;;  %v195_v50 = vsel %vm1057_vm1, %v193_v1, %v194_v48  ;;  %v196_v51 = vsel %vm1058_vm10, %v194_v48, %v193_v1 }
  0x43   :  { %v191_v49 = vmax.f32 %v183_v41, %v189_v47  ;;  %v197_v52 = vsel %vm126_vm5, %v195_v50, 0.0  ;;  %v198_v54 = vsel %vm127_vm9, %v196_v51, 0.0 }
  0x44   :  { %v901_v58 = vmax.f32 %v192_v44, %v198_v54 }
  0x45   :  { %v899_v55 = vmax.f32 %v191_v49, %v197_v52 }
  0x47   :  { %v451_v56 = vpack.i.bf16 %v901_v58, %v899_v55 }
  0x49   :  { %452 = vrot.lane.b32.xlu1 %v451_v56, %s541_s22  ;;  %442 = vrot.lane.b32.xlu0 %v451_v56, %s539_s20 }
  0x4d   :  { %467 = vrot.lane.b32.xlu1 %v446_v18, %s538_s0  ;;  %457 = vrot.lane.b32.xlu0 %v446_v18, %s541_s22 }
  0x51   :  { %472 = vrot.lane.b32.xlu1 %v451_v56, %s540_s21  ;;  %462 = vrot.lane.b32.xlu0 %v451_v56, %s538_s0 }
  0x55   :  { %482 = vrot.lane.b32.xlu1 %v815_v53, %s540_s21  ;;  %477 = vrot.lane.b32.xlu0 %v446_v18, %s540_s21 }
  0x89   :  { %v129_v3 = vpop.permute.xlu0 %128  ;;  %v150_v63 = vpop.permute.xlu1 %149 }
  0x8a   :  { %v130_v6 = vsub.s32 %v129_v3, %v577_v2  ;;  %v151_v61 = vsub.s32 %v150_v63, %v577_v2  ;;  %v135_v62 = vshra.s32 %v129_v3, 4  ;;  %v156_v19 = vshra.s32 %v150_v63, 4 }
  0x8c   :  { %v132_v11 = vsub.s32 0, %v130_v6  ;;  %v153_v7 = vsub.s32 0, %v151_v61  ;;  %vm137_vm5 = vcmp.eq.s32.totalorder %v135_v62, %v136_v60  ;;  %vm157_vm0 = vcmp.eq.s32.totalorder %v156_v19, %v136_v60 }
  0x8d   :  { %v140_v57 = vpop.permute.xlu0 %139  ;;  %v160_v16 = vpop.permute.xlu1 %159 }
  0x8e   :  { %v141_v59 = vsub.s32 %v140_v57, %v577_v2  ;;  %v412_v0 = vmin.u32 %v132_v11, %v130_v6  ;;  %v161_v8 = vsub.s32 %v160_v16, %v577_v2  ;;  %v146_v15 = vshra.s32 %v140_v57, 4 }
  0x8f   :  { %v414_v24 = vmin.u32 %v153_v7, %v151_v61  ;;  %v166_v33 = vshra.s32 %v160_v16, 4 }
  0x90   :  { %v143_v4 = vsub.s32 0, %v141_v59  ;;  %vm134_vm8 = vcmp.le.s32.totalorder %v412_v0, 2  ;;  %v163_v25 = vsub.s32 0, %v161_v8  ;;  %vm147_vm13 = vcmp.eq.s32.totalorder %v146_v15, %v136_v60 }
  0x91   :  { %vm919_vm9 = vmand %vm134_vm8, %vm137_vm5  ;;  %vm155_vm14 = vcmp.le.s32.totalorder %v414_v24, 2  ;;  %vm952_vm6 = vcmp.eq.s32.totalorder %v166_v33, %v136_v60 }
  0x92   :  { %v413_v14 = vmin.u32 %v143_v4, %v141_v59  ;;  %v415_v32 = vmin.u32 %v163_v25, %v161_v8  ;;  %vm938_vm2 = vmand %vm155_vm14, %vm157_vm0 }
  0x94   :  { %vm145_vm7 = vcmp.le.s32.totalorder %v413_v14, 2  ;;  %vm165_vm15 = vcmp.le.s32.totalorder %v415_v32, 2 }
  0x95   :  { %vm929_vm12 = vmand %vm145_vm7, %vm147_vm13 }
  0x96   :  { %vm976_vm3 = vmand %vm165_vm15, %vm952_vm6 }
  0xa6   :  { %v433_v5 = vpop.permute.xlu1 %432  ;;  %v428_v53 = vpop.permute.xlu0 %427 }
  0xa7   :  { %v430_v13 = vunpack.i.h.bf16 %v428_v53  ;;  %v429_v9 = vunpack.i.l.bf16 %v428_v53  ;;  %v435_v2 = vunpack.i.h.bf16 %v433_v5  ;;  %v434_v22 = vunpack.i.l.bf16 %v433_v5 }
  0xa9   :  { %v334_v27 = vsel %vm919_vm9, %v430_v13, 0.0  ;;  %v333_v17 = vsel %vm919_vm9, %v429_v9, 0.0  ;;  %v342_v34 = vsel %vm929_vm12, %v435_v2, 0.0  ;;  %v341_v35 = vsel %vm929_vm12, %v434_v22, 0.0 }
  0xaa   :  { %v438_v21 = vpop.permute.xlu0 %437  ;;  %v336_v28 = vmax.f32 %v801_v43, %v334_v27  ;;  %v335_v29 = vmax.f32 %v799_v42, %v333_v17 }
  0xab   :  { %v440_v12 = vunpack.i.h.bf16 %v438_v21  ;;  %v439_v1 = vunpack.i.l.bf16 %v438_v21 }
  0xac   :  { %v942_v37 = vmax.f32 %v335_v29, %v341_v35  ;;  %v344_v26 = vmax.f32 %v336_v28, %v342_v34 }
  0xad   :  { %v350_v41 = vsel %vm938_vm2, %v440_v12, 0.0  ;;  %v349_v46 = vsel %vm938_vm2, %v439_v1, 0.0 }
  0xae   :  { %v351_v63 = vmax.f32 %v942_v37, %v349_v46  ;;  %v352_v6 = vmax.f32 %v344_v26, %v350_v41 }
  0xb2   :  { %v448_v23 = vpop.permute.xlu1 %447 }
  0xb3   :  { %v450_v39 = vunpack.i.h.bf16 %v448_v23  ;;  %v449_v42 = vunpack.i.l.bf16 %v448_v23 }
  0xb5   :  { %v270_v52 = vsel %vm919_vm9, %v450_v39, 0.0  ;;  %v269_v54 = vsel %vm919_vm9, %v449_v42, 0.0 }
  0xb6   :  { %v272_v62 = vmax.f32 %v860_v30, %v270_v52  ;;  %v271_v0 = vmax.f32 %v866_v31, %v269_v54 }
  0xbb   :  { %v453_v38 = vpop.permute.xlu1 %452  ;;  %v443_v43 = vpop.permute.xlu0 %442 }
  0xbc   :  { %v445_v40 = vunpack.i.h.bf16 %v443_v43  ;;  %v444_v18 = vunpack.i.l.bf16 %v443_v43  ;;  %v455_v49 = vunpack.i.h.bf16 %v453_v38  ;;  %v454_v44 = vunpack.i.l.bf16 %v453_v38 }
  0xbe   :  { %v206_v47 = vsel %vm919_vm9, %v445_v40, 0.0  ;;  %v205_v45 = vsel %vm919_vm9, %v444_v18, 0.0  ;;  %v214_v4 = vsel %vm929_vm12, %v455_v49, 0.0 }
  0xbf   :  { %v468_v50 = vpop.permute.xlu1 %467  ;;  %v458_v51 = vpop.permute.xlu0 %457  ;;  %v208_v57 = vmax.f32 %v901_v58, %v206_v47  ;;  %v207_v11 = vmax.f32 %v899_v55, %v205_v45  ;;  %v213_v58 = vsel %vm929_vm12, %v454_v44, 0.0 }
  0xc0   :  { %v460_v56 = vunpack.i.h.bf16 %v458_v51  ;;  %v459_v3 = vunpack.i.l.bf16 %v458_v51  ;;  %v470_v16 = vunpack.i.h.bf16 %v468_v50  ;;  %v469_v59 = vunpack.i.l.bf16 %v468_v50 }
  0xc1   :  { %v215_v15 = vmax.f32 %v207_v11, %v213_v58  ;;  %v216_v19 = vmax.f32 %v208_v57, %v214_v4 }
  0xc2   :  { %v278_v60 = vsel %vm929_vm12, %v460_v56, 0.0  ;;  %v277_v61 = vsel %vm929_vm12, %v459_v3, 0.0  ;;  %v286_v31 = vsel %vm938_vm2, %v470_v16, 0.0  ;;  %v285_v20 = vsel %vm938_vm2, %v469_v59, 0.0 }
  0xc3   :  { %v473_v5 = vpop.permute.xlu1 %472  ;;  %v463_v55 = vpop.permute.xlu0 %462  ;;  %v280_v9 = vmax.f32 %v272_v62, %v278_v60  ;;  %v279_v14 = vmax.f32 %v271_v0, %v277_v61 }
  0xc4   :  { %v475_v53 = vunpack.i.h.bf16 %v473_v5  ;;  %v474_v7 = vunpack.i.l.bf16 %v473_v5  ;;  %v465_v8 = vunpack.i.h.bf16 %v463_v55  ;;  %v464_v13 = vunpack.i.l.bf16 %v463_v55 }
  0xc5   :  { %v287_v33 = vmax.f32 %v279_v14, %v285_v20  ;;  %v288_v34 = vmax.f32 %v280_v9, %v286_v31 }
  0xc6   :  { %v222_v21 = vsel %vm938_vm2, %v465_v8, 0.0  ;;  %v221_v23 = vsel %vm938_vm2, %v464_v13, 0.0  ;;  %v230_v24 = vsel %vm976_vm3, %v475_v53, 0.0  ;;  %v229_v25 = vsel %vm976_vm3, %v474_v7, 0.0 }
  0xc7   :  { %v223_v27 = vmax.f32 %v215_v15, %v221_v23  ;;  %v224_v17 = vmax.f32 %v216_v19, %v222_v21  ;;  %v483_v2 = vpop.permute.xlu1 %482  ;;  %v478_v22 = vpop.permute.xlu0 %477 }
  0xc8   :  { %v485_v28 = vunpack.i.h.bf16 %v483_v2  ;;  %v484_v29 = vunpack.i.l.bf16 %v483_v2  ;;  %v480_v10 = vunpack.i.h.bf16 %v478_v22  ;;  %v479_v12 = vunpack.i.l.bf16 %v478_v22 }
  0xc9   :  { %v231_v1 = vmax.f32 %v223_v27, %v229_v25  ;;  %v232_v32 = vmax.f32 %v224_v17, %v230_v24 }
  0xca   :  { %v358_v35 = vsel %vm976_vm3, %v485_v28, 0.0  ;;  %v357_v38 = vsel %vm976_vm3, %v484_v29, 0.0  ;;  %v294_v43 = vsel %vm976_vm3, %v480_v10, 0.0  ;;  %v293_v39 = vsel %vm976_vm3, %v479_v12, 0.0 }
  0xcb   :  { %v360_v42 = vmax.f32 %v352_v6, %v358_v35  ;;  %v359_v40 = vmax.f32 %v351_v63, %v357_v38  ;;  %v295_v18 = vmax.f32 %v287_v33, %v293_v39  ;;  %v296_v36 = vmax.f32 %v288_v34, %v294_v43 }
  0xcd   :  { %v363_v37 = vmul.f32 %v359_v40, %v231_v1  ;;  %v364_v26 = vmul.f32 %v360_v42, %v232_v32  ;;  %v361_v41 = vmul.f32 %v295_v18, %v231_v1  ;;  %v362_v46 = vmul.f32 %v296_v36, %v232_v32 }
  0xce   :  { %v365_v47 = vmul.f32 %v359_v40, %v295_v18  ;;  %v366_v45 = vmul.f32 %v360_v42, %v296_v36 }
  0xcf   :  { %369 = vst [vmem:[#allocation5 + $0x10] sm:$0xff] %v363_v37  ;;  %370 = vst [vmem:[#allocation5 + $0x18] sm:$0xff] %v364_v26 }
  0xd0   :  { %367 = vst [vmem:[#allocation5] sm:$0xff] %v361_v41  ;;  %368 = vst [vmem:[#allocation5 + $0x8] sm:$0xff] %v362_v46 }
  0xd1   :  { %371 = vst [vmem:[#allocation5 + $0x20] sm:$0xff] %v365_v47  ;;  %372 = vst [vmem:[#allocation5 + $0x28] sm:$0xff] %v366_v45 }
  0xd2   :  { %519 = shalt.err (!%p516_p12)
}
  0xd3   :  { %s520_s28 = scalar_lea.hbm %s1016_s1, 1792 }
  0xd4   :  { %p521_p13 = scmp.ne.s32.totalorder %s1016_s1, %s520_s28  ;;  %p524_p0 = scmp.lt.u32.totalorder %s520_s28, %s1016_s1 }
  0xd6   :  { %p526_p1 = pnand %p524_p0, %p521_p13 }
  0xd8   :  { %529 = shalt.err (!%p526_p1)
}
  0xd9   :  { %392 = dma.vmem_to_hbm [thread:$0]  %s387_s24, 1792, %s1016_s1, [#allocation4], %s535_s16, %s535_s16, %s536_s17  }
  0xda   :  { %532 = dma.done.wait [#allocation4], 1792  }
  0xdb   :  { %533 = vsyncadd [#allocation4], 4294965504 }
  0xdc   :  { %396 = vsyncpa [#allocation3], 1 }
  0xdd   :  { %397 = vsyncpa [#allocation4], 1 }

</bundles_post_ra>
